<compile_context>
chip_gen: v7x
topology: tpu7x:2x2x1
jax: 0.10.0
libtpu: 0.0.40
codegen_flags: <defaults>
</compile_context>

<pallas_src>
import jax
import jax.numpy as jnp
from jax.experimental import pallas as pl
from jax.experimental.pallas import tpu as pltpu


def _round_up(x, m):
    return ((x + m - 1) // m) * m


def _gcn_matmul_kernel(adj_ref, emb_ref, out_ref):
    # grid = (N_pad // tm, K_pad // tk); reduction axis (k) is last, and the
    # output block index is invariant in k, so the f32 output block itself is
    # the accumulator (no scratch needed).
    @pl.when(pl.program_id(1) == 0)
    def _():
        out_ref[...] = jnp.zeros_like(out_ref)

    out_ref[...] += jnp.dot(
        adj_ref[...], emb_ref[...], preferred_element_type=jnp.float32
    )


def _choose_tiles(N, K, D_pad):
    # Row tile: large, but keep >= 2 row-blocks when N is big enough so the
    # "parallel" grid axis can use both TensorCores on v7x.
    n8 = _round_up(N, 8)
    if n8 > 512:
        tm = 512
    elif n8 >= 256:
        tm = _round_up((n8 + 1) // 2, 8)
    else:
        tm = n8
    # Reduction tile: big (multiples of 256 fill the 256-wide MXU on v6e/v7x,
    # and large tk amortizes the ~0.35 us per-grid-step overhead).
    tk = min(_round_up(K, 128), 1024)

    # Keep double-buffered bf16 inputs + resident f32 output panel under
    # ~12 MiB so the default scoped-VMEM limit is fine on every chip.
    budget = 12 * 1024 * 1024

    def footprint(tm_, tk_):
        return (2 * tm_ * tk_ * 2          # adj tile   (bf16, double-buffered)
                + 2 * tk_ * D_pad * 2      # embeds panel (bf16, double-buffered)
                + 2 * tm_ * D_pad * 4)     # resident f32 output panel

    while footprint(tm, tk) > budget and tk > 128:
        tk = max(128, tk // 2)
    while footprint(tm, tk) > budget and tm > 8:
        tm = max(8, tm // 2)
    return tm, tk


def gcn_layer(adj, embeds):
    """Pallas implementation of GCNLayer.forward(adj, embeds) = adj @ embeds."""
    N, K = adj.shape
    K2, D = embeds.shape
    assert K == K2, "adj columns must match embeds rows"

    D_pad = _round_up(D, 128)
    tm, tk = _choose_tiles(N, K, D_pad)
    N_pad = _round_up(N, tm)
    K_pad = _round_up(K, tk)

    # bf16 inputs for the MXU (accumulation stays f32); zero-pad to tile
    # multiples — padded zeros contribute nothing to the matmul.
    adj_bf = adj.astype(jnp.bfloat16)
    emb_bf = embeds.astype(jnp.bfloat16)
    if (N_pad, K_pad) != (N, K):
        adj_bf = jnp.zeros((N_pad, K_pad), jnp.bfloat16).at[:N, :K].set(adj_bf)
    if (K_pad, D_pad) != (K, D):
        emb_bf = jnp.zeros((K_pad, D_pad), jnp.bfloat16).at[:K, :D].set(emb_bf)

    grid = (N_pad // tm, K_pad // tk)

    cost = pl.CostEstimate(
        flops=2 * N_pad * K_pad * D_pad,
        transcendentals=0,
        bytes_accessed=(N_pad * K_pad * 2                 # adj streamed once
                        + grid[0] * K_pad * D_pad * 2     # embeds per row-block
                        + N_pad * D_pad * 4),             # output written once
    )

    out = pl.pallas_call(
        _gcn_matmul_kernel,
        out_shape=jax.ShapeDtypeStruct((N_pad, D_pad), jnp.float32),
        grid_spec=pltpu.PrefetchScalarGridSpec(
            num_scalar_prefetch=0,
            grid=grid,
            in_specs=[
                pl.BlockSpec((tm, tk), lambda i, k: (i, k)),      # adj tile
                pl.BlockSpec((tk, D_pad), lambda i, k: (k, 0)),   # embeds panel
            ],
            out_specs=pl.BlockSpec((tm, D_pad), lambda i, k: (i, 0)),
        ),
        compiler_params=pltpu.CompilerParams(
            dimension_semantics=("parallel", "arbitrary")
        ),
        cost_estimate=cost,
    )(adj_bf, emb_bf)

    if N_pad != N or D_pad != D:
        out = out[:N, :D]
    return out


# TODO(synk): the `flag=False` branch (torch_sparse.spmm over COO
# indices/values) has no clean Pallas equivalent; it is semantically identical
# to the dense matmul above, so only the dense path is implemented.
# TODO(synk): block-sparsity skipping (scalar-prefetched nonzero-block table +
# data-dependent index_map) would cut adj HBM traffic ~10x on real graphs; not
# implemented here since the adjacency arrives densely materialized.


if __name__ == "__main__":
    key = jax.random.PRNGKey(0)
    k_adj, k_emb = jax.random.split(key)

    N = 256   # number of graph nodes
    D = 128   # embedding dim

    # Deterministic, sparse-ish (row-normalized) adjacency, materialized densely.
    raw = jax.random.uniform(k_adj, (N, N), dtype=jnp.float32)
    mask = (raw > 0.9).astype(jnp.float32)          # ~10% density
    adj = mask + jnp.eye(N, dtype=jnp.float32)      # add self loops
    deg = jnp.sum(adj, axis=1, keepdims=True)
    adj = adj / deg                                  # row-normalize

    embeds = jax.random.normal(k_emb, (N, D), dtype=jnp.float32)

    out = gcn_layer(adj, embeds)
    out = jax.block_until_ready(out)

    # Correctness check against plain JAX f32 matmul (== torch.spmm semantics).
    # Tolerance is loosened vs the pure-f32 kernel since MXU inputs are bf16
    # (accumulation is still f32).
    ref = adj @ embeds
    assert out.shape == (N, D)
    assert jnp.allclose(out, ref, atol=2e-2, rtol=2e-2), "mismatch vs reference"

    print("KERNEL_OK")
</pallas_src>

<mosaic_0001>
module attributes {stable_mosaic.version = 11 : i64} {
  func.func @_gcn_matmul_kernel(%arg0: i32, %arg1: i32, %arg2: memref<128x256xbf16, #tpu.memory_space<vmem>>, %arg3: memref<256x128xbf16, #tpu.memory_space<vmem>>, %arg4: memref<128x128xf32, #tpu.memory_space<vmem>>) attributes {dimension_semantics = [#tpu.dimension_semantics<parallel>, #tpu.dimension_semantics<arbitrary>], iteration_bounds = array<i64: 2, 1>, scalar_prefetch = 0 : i64, scratch_operands = 0 : i64, tpu.core_type = #tpu.core_type<tc>, window_params = [{transform_indices = @transform_0, window_bounds = array<i64: 128, 256>}, {transform_indices = @transform_1, window_bounds = array<i64: 256, 128>}, {transform_indices = @transform_2, window_bounds = array<i64: 128, 128>}]} {
    %c0_i32 = arith.constant 0 : i32
    %0 = arith.cmpi eq, %arg1, %c0_i32 : i32
    %1 = arith.extui %0 : i1 to i32
    %c0_i32_0 = arith.constant 0 : i32
    %2 = arith.cmpi ne, %1, %c0_i32_0 : i32
    scf.if %2 {
      %cst_8 = arith.constant 0.000000e+00 : f32
      %9 = vector.broadcast %cst_8 : f32 to vector<128x128xf32>
      %c0_9 = arith.constant 0 : index
      %c0_10 = arith.constant 0 : index
      %10 = vector.load %arg4[%c0_9, %c0_10] : memref<128x128xf32, #tpu.memory_space<vmem>>, vector<128x128xf32>
      tpu.vector_store %arg4[%c0_9, %c0_10], %9 {strides = array<i32>} : memref<128x128xf32, #tpu.memory_space<vmem>>, vector<128x128xf32>,
    } else {
    }
    %c0 = arith.constant 0 : index
    %c0_1 = arith.constant 0 : index
    %3 = vector.load %arg4[%c0, %c0_1] : memref<128x128xf32, #tpu.memory_space<vmem>>, vector<128x128xf32>
    %c0_2 = arith.constant 0 : index
    %c0_3 = arith.constant 0 : index
    %4 = vector.load %arg2[%c0_2, %c0_3] : memref<128x256xbf16, #tpu.memory_space<vmem>>, vector<128x256xbf16>
    %c0_4 = arith.constant 0 : index
    %c0_5 = arith.constant 0 : index
    %5 = vector.load %arg3[%c0_4, %c0_5] : memref<256x128xbf16, #tpu.memory_space<vmem>>, vector<256x128xbf16>
    %cst = arith.constant dense<0.000000e+00> : vector<128x128xf32>
    %6 = tpu.matmul %4, %5, %cst {dimension_numbers = #tpu.dot_dimension_numbers<[1], [0], [0], [1], [0, 0, 1, 1], [], []>} : vector<128x256xbf16>, vector<256x128xbf16>, vector<128x128xf32> -> vector<128x128xf32>
    %7 = arith.addf %3, %6 : vector<128x128xf32>
    %c0_6 = arith.constant 0 : index
    %c0_7 = arith.constant 0 : index
    %8 = vector.load %arg4[%c0_6, %c0_7] : memref<128x128xf32, #tpu.memory_space<vmem>>, vector<128x128xf32>
    tpu.vector_store %arg4[%c0_6, %c0_7], %7 {strides = array<i32>} : memref<128x128xf32, #tpu.memory_space<vmem>>, vector<128x128xf32>,
    return
  }
  func.func @transform_0(%arg0: i32, %arg1: i32) -> (i32, i32) {
    %c0_i32 = arith.constant 0 : i32
    return %arg0, %arg1 : i32, i32
  }
  func.func @transform_1(%arg0: i32, %arg1: i32) -> (i32, i32) {
    %c0_i32 = arith.constant 0 : i32
    %c0_i32_0 = arith.constant 0 : i32
    return %arg1, %c0_i32 : i32, i32
  }
  func.func @transform_2(%arg0: i32, %arg1: i32) -> (i32, i32) {
    %c0_i32 = arith.constant 0 : i32
    %c0_i32_0 = arith.constant 0 : i32
    return %arg0, %c0_i32 : i32, i32
  }
}

</mosaic_0001>

<bundles_post_ra>
// kernel: tpu_custom_call.1
= control target key start
LH: loop header
LB: loop body
LE: loop exit
PB: predicated region body
PF: predicated region fallthrough
CT: control target
= control target key end

     0   :  { %7 = vsyncpa [#allocation3], 0  ;;  %s1389_s0 = inlined_call_operand.hbm [shape: bf16[256,256], index: 0, kind: input, shape index: {}]   ;;  %s1390_s1 = inlined_call_operand.hbm [shape: bf16[256,128], index: 1, kind: input, shape index: {}]   ;;  %s1391_s2 = inlined_call_operand.hbm [shape: f32[256,128], index: 2, kind: output, shape index: {}]  }
   0x1   :  { %9 = vsyncpa [#allocation3 + $0x1], 0 }
   0x2   :  { %10 = vsyncpa [#allocation6], 0 }
   0x3   :  { %11 = vsyncpa [#allocation4], 0 }
   0x4   :  { %13 = vsyncpa [#allocation4 + $0x1], 0  ;;  %s1129_s9 = smov 0   ;;  %s1131_s10 = smov 0  }
   0x5   :  { %s1133_s11 = smov 0   ;;  %s1135_s12 = smov 0  }
   0x6   :  { %s1137_s13 = smov 0   ;;  %s1139_s14 = smov 0  }
   0x7 LB: > { %s706_s15 = sadd.s32 4294967295, %s1103_s14   ;;  %s707_s16 = sadd.s32 4294967294, %s1103_s14   ;;  %s1103_s14 = sphi %s1139_s14, %s19_s14   ;;  %s1099_s13 = sphi %s1137_s13, %s1415_s13   ;;  %s1095_s12 = sphi %s1135_s12, %s1414_s12   ;;  %s1091_s11 = sphi %s1133_s11, %s1413_s11   ;;  %s1087_s10 = sphi %s1131_s10, %s1412_s10   ;;  %s1083_s9 = sphi %s1129_s9, %s1411_s9  }
   0x8   : > { %p53_p0 = scmp.ne.s32.totalorder %s1087_s10, %s1083_s9  ;;  %p1163_p1 = scmp.eq.s32.totalorder %s706_s15, 0 }
   0x9   : > { %p1167_p2 = scmp.eq.s32.totalorder %s706_s15, 1  ;;  %p109_p3 = scmp.eq.s32.totalorder %s707_s16, 1 }
   0xa   : > { %s1396_s17 = scalar_select %p1163_p1, 1, 0 }
   0xb   : > { %s1397_s18 = scalar_select %p1167_p2, 1, 0 }
   0xc   : > { %p1173_p4 = por %p1163_p1, %p53_p0  ;;  %p708_p5 = scmp.ge.s32.totalorder %s1103_s14, 1 }
   0xd   : > { %p1178_p6 = por %p109_p3, %p53_p0  ;;  %p116_p7 = scmp.lt.s32.totalorder %s1103_s14, 3 }
   0xe   : > { %s1398_s19 = scalar_select %p1173_p4, 1, 0 }
   0xf   : > { %s1399_s20 = scalar_select %p1178_p6, 1, 0 }
  0x10   : > { %p1183_p8 = pnand %p708_p5, %p116_p7  ;;  %s1105_s22 = smov [#allocation5]  }
  0x11   : > { %s131_s23 = sshll.u32 %s1105_s22, 4  ;;  %s31_s25 = sadd.s32 1, %s1099_s13  ;;  %s132_s23 = int_to_ptr.vmem [resolvable:$true] %s131_s23 }
  0x12   : > { %s1400_s21 = scalar_select %p1183_p8, 1, 0 }
  0x13   : > { %p847_p9 = pneg %p1183_p8  ;;  %s959_s28 = scalar_lea.hbm %s1390_s1, 2048 }
  0x14   : > { %p960_p12 = scmp.ne.s32.totalorder %s1390_s1, %s959_s28  ;;  %p966_p5 = scmp.lt.u32.totalorder %s959_s28, %s1390_s1 }
  0x15   : > { %p1192_p11 = pnand %p847_p9, %p1163_p1 }
  0x17   : > { %p961_p13 = pneg %p1192_p11 }
  0x19   : > { %p962_p0 = pnand %p961_p13, %p960_p12 }
  0x1b   : > { %p963_p3 = pneg %p962_p0 }
  0x1d   : > { %p968_p7 = pnand %p966_p5, %p963_p3 }
  0x1f   : > { %971 = shalt.err (!%p968_p7)
}
  0x20   : > { %s972_s5 = scalar_lea.vmem %s132_s23, 2048  ;;  %p980_p1 = scmp.lt.s32.totalorder %s132_s23, %s132_s23 }
  0x21   : > { %p973_p9 = scmp.ne.s32.totalorder %s132_s23, %s972_s5  ;;  %p981_p4 = scmp.lt.s32.totalorder %s972_s5, %s972_s5 }
  0x23   : > { %p975_p10 = pnand %p973_p9, %p961_p13  ;;  %p982_p8 = por %p981_p4, %p980_p1 }
  0x25   : > { %p976_p6 = pneg %p975_p10 }
  0x27   : > { %p983_p2 = pnand %p982_p8, %p976_p6 }
  0x29   : > { %986 = shalt.err (!%p983_p2)
}
  0x2a   : > { %s1106_s6 = smov 64   ;;  %s1107_s7 = smov 4  }
  0x2b   : > { %850 = dma.hbm_to_vmem [thread:$0]  (!%p1192_p11), %s1390_s1, 2048, %s132_s23, [#allocation6], %s1106_s6, %s1106_s6, %s1107_s7  }
  0x2c   : > { %p33_p1 = scmp.ge.s32.totalorder %s31_s25, 2  ;;  %s40_s16 = sadd.s32 1, %s1091_s11 }
  0x2d   : > { %p47_p2 = scmp.ne.s32.totalorder %s1091_s11, %s1087_s10  ;;  %p48_p4 = scmp.eq.s32.totalorder %s1103_s14, 0 }
  0x2e   : > { %s1417_s25 = smov (%p33_p1, %s31_s25), 0  ;;  %p1403_p8 = scmp.ne.s32.totalorder %s1397_s18, 0 }
  0x2f   : > { %p1219_p6 = por %p48_p4, %p47_p2  ;;  %s35_s24 = ssub.s32 %s1099_s13, %s1417_s25 }
  0x30   : > { %p1225_p10 = por %p1403_p8, %p47_p2  ;;  %p860_p12 = scmp.lt.s32.totalorder %s1103_s14, 2 }
  0x31   : > { %p38_p11 = scmp.eq.s32.totalorder %s35_s24, 0  ;;  %s145_s23 = sand.u32 1, %s1091_s11  }
  0x32   : > { %s711_s27 = sshll.u32 %s145_s23, 7  ;;  %s757_s29 = sshll.u32 %s1099_s13, 11 }
  0x33   : > { %s1234_s28 = scalar_select %p38_p11, %s1091_s11, %s40_s16  }
  0x34   : > { %s1240_s4 = scalar_lea.hbm %s1389_s0, %s757_s29  ;;  %s149_s18 = scalar_lea.vmem [#allocation2], %s711_s27 }
  0x35   : > { %s159_s5 = sshll.u32 %s149_s18, 4  ;;  %p1246_p13 = pnand %p860_p12, %p1219_p6  ;;  %s1242_s5 = int_to_ptr.vmem [resolvable:$true] %s159_s5 }
  0x36   : > { %s1250_s7 = scalar_lea.sflag [#allocation3], %s145_s23  ;;  %s987_s8 = scalar_lea.hbm %s1240_s4, 2048 }
  0x37   : > { %p988_p0 = scmp.ne.s32.totalorder %s1240_s4, %s987_s8  ;;  %p989_p3 = pneg %p1246_p13 }
  0x38   : > { %s992_s22 = scalar_lea.hbm %s1389_s0, 4096  ;;  %p993_p9 = scmp.lt.u32.totalorder %s1240_s4, %s1389_s0 }
  0x39   : > { %p990_p5 = pnand %p989_p3, %p988_p0  ;;  %p994_p1 = scmp.lt.u32.totalorder %s992_s22, %s987_s8 }
  0x3a   : > { %p996_p4 = scmp.lt.u32.totalorder %s987_s8, %s1240_s4 }
  0x3b   : > { %p991_p7 = pneg %p990_p5  ;;  %p995_p2 = por %p994_p1, %p993_p9 }
  0x3d   : > { %p997_p6 = por %p996_p4, %p995_p2 }
  0x3f   : > { %p998_p8 = pnand %p997_p6, %p991_p7 }
  0x41   : > { %1001 = shalt.err (!%p998_p8)
}
  0x42   : > { %s1002_s23 = scalar_lea.vmem %s1242_s5, 2048  ;;  %s1108_s29 = smov [#allocation2]  }
  0x43   : > { %p1003_p12 = scmp.ne.s32.totalorder %s1242_s5, %s1002_s23  ;;  %s1007_s30 = sshll.u32 %s1108_s29, 4  ;;  %s1008_s30 = int_to_ptr.vmem [resolvable:$false] %s1007_s30 }
  0x44   : > { %s1009_s3 = scalar_lea.vmem %s1008_s30, 4096  ;;  %p1010_p5 = scmp.lt.s32.totalorder %s1242_s5, %s1008_s30 }
  0x45   : > { %p1005_p11 = pnand %p1003_p12, %p989_p3  ;;  %p1011_p9 = scmp.lt.s32.totalorder %s1009_s3, %s1002_s23 }
  0x47   : > { %p1006_p0 = pneg %p1005_p11  ;;  %p1012_p1 = por %p1011_p9, %p1010_p5 }
  0x49   : > { %p1013_p2 = pnand %p1012_p1, %p1006_p0 }
  0x4b   : > { %1016 = shalt.err (!%p1013_p2)
}
  0x4c   : > { %s1109_s18 = smov 128   ;;  %s1110_s8 = smov 8  }
  0x4d   : > { %854 = dma.hbm_to_vmem [thread:$0]  (!%p1246_p13), %s1240_s4, 2048, %s1242_s5, %s1250_s7, %s1109_s18, %s1109_s18, %s1110_s8  }
  0x4e   : > { %p1406_p3 = scmp.ne.s32.totalorder %s1400_s21, 0 }
  0x4f   : > { %s1281_s15 = sand.u32 (!%p1406_p3), 1, %s1087_s10   ;;  %p1407_p7 = scmp.ne.s32.totalorder (!%p1406_p3), %s1398_s19, 0 }
  0x50   : > { %171 = sbr.rel (%p1406_p3) target bundleno = 380 (0x17c), region = 28  ;;  %s716_s16 = sshll.u32 (!%p1406_p3), %s1281_s15, 7 }
  0x51   : > { %s174_s22 = scalar_lea.sflag (!%p1406_p3), [#allocation3], %s1281_s15  ;;  %s1287_s24 = scalar_lea.vmem (!%p1406_p3), [#allocation2], %s716_s16 }
  0x57   : > { %1070 = dma.done.wait (%p1407_p7), %s174_s22, 2048  }
  0x58   : > { %1072 = vsyncadd (%p1407_p7), %s174_s22, 4294965248  ;;  %p1408_p13 = scmp.ne.s32.totalorder %s1396_s17, 0 }
  0x5a   : > { %1074 = dma.done.wait (%p1408_p13), [#allocation6], 2048  }
  0x5b   : > { %1076 = vsyncadd (%p1408_p13), [#allocation6], 4294965248  ;;  %v919_v0 = vld [vmem:[#allocation5 + $0x40] sm:$0xff]   ;;  %v921_v2 = vld [vmem:[#allocation5 + $0x48] sm:$0xff]   ;;  %s1315_s17 = scalar_lea.vmem [#allocation7], %s716_s16  ;;  %s758_s19 = sshll.u32 %s1095_s12, 11 }
  0x5c   : > { %v920_v1 = vld [vmem:[#allocation5] sm:$0xff]   ;;  %759 = vmatprep.subr.bf16.mxu0 %v919_v0  ;;  %823 = vmatprep.subr.bf16.mxu1 %v919_v0  ;;  %v922_v3 = vld [vmem:[#allocation5 + $0x8] sm:$0xff]   ;;  %v923_v4 = vld [vmem:[#allocation5 + $0x50] sm:$0xff]   ;;  %s610_s21 = sshll.u32 %s1315_s17, 4  ;;  %s1334_s6 = scalar_lea.hbm %s1391_s2, %s758_s19  ;;  %s1336_s21 = int_to_ptr.vmem [resolvable:$true] %s610_s21 }
  0x5d   : > { %760 = vmatpush3.bf16.msra.mxu0 %v920_v1  ;;  %831 = vmatpush3.bf16.msra.mxu1 %v920_v1  ;;  %v924_v5 = vld [vmem:[#allocation5 + $0x10] sm:$0xff]   ;;  %v925_v6 = vld [vmem:[#allocation5 + $0x58] sm:$0xff]   ;;  %v927_v8 = vld [vmem:[#allocation5 + $0x60] sm:$0xff]   ;;  %s597_s12 = scalar_lea.sflag [#allocation4], %s1281_s15  ;;  %s1017_s7 = scalar_lea.vmem %s1336_s21, 2048 }
  0x5e   : > { %761 = vmatprep.subr.bf16.mxu0 %v921_v2  ;;  %824 = vmatprep.subr.bf16.mxu1 %v921_v2  ;;  %v926_v7 = vld [vmem:[#allocation5 + $0x18] sm:$0xff]   ;;  %v928_v9 = vld [vmem:[#allocation5 + $0x20] sm:$0xff]   ;;  %v929_v10 = vld [vmem:[#allocation5 + $0x68] sm:$0xff]   ;;  %p1018_p4 = scmp.ne.s32.totalorder %s1336_s21, %s1017_s7  ;;  %s1111_s27 = smov [#allocation7]  }
  0x5f   : > { %v937_v11 = vld [vmem:[%s1287_s24 + $0x4] ss:$8 sps:$4 sm:$0xff]   ;;  %v931_v14 = vld [vmem:[#allocation5 + $0x70] sm:$0xff]   ;;  %v933_v16 = vld [vmem:[#allocation5 + $0x78] sm:$0xff]   ;;  %s1021_s23 = sshll.u32 %s1111_s27, 4  ;;  %s1022_s23 = int_to_ptr.vmem [resolvable:$false] %s1021_s23 }
  0x60   : > { %v940_v12 = vld [vmem:[%s1287_s24 + $0x44] ss:$8 sps:$4 sm:$0xff]   ;;  %499 = vmatprep.mubr.bf16.mxu0 %v937_v11  ;;  %v932_v15 = vld [vmem:[#allocation5 + $0x30] sm:$0xff]   ;;  %v934_v17 = vld [vmem:[#allocation5 + $0x38] sm:$0xff]   ;;  %p1019_p6 = pnand %p1018_p4, %p1225_p10  ;;  %s1023_s29 = scalar_lea.vmem %s1022_s23, 4096 }
  0x61   : > { %762 = vmatpush3.bf16.msra.mxu0 %v922_v3  ;;  %832 = vmatpush3.bf16.msra.mxu1 %v922_v3  ;;  %v930_v13 = vld [vmem:[#allocation5 + $0x28] sm:$0xff]   ;;  %v941_v20 = vld [vmem:[%s1287_s24 + $0x14] ss:$8 sps:$4 sm:$0xff]   ;;  %v945_v22 = vld [vmem:[%s1287_s24 + $0x10] ss:$8 sps:$4 sm:$0xff]   ;;  %p1024_p12 = scmp.lt.s32.totalorder %s1336_s21, %s1022_s23  ;;  %p1025_p11 = scmp.lt.s32.totalorder %s1023_s29, %s1017_s7 }
  0x62   : > { %763 = vmatprep.subr.bf16.mxu0 %v923_v4  ;;  %825 = vmatprep.subr.bf16.mxu1 %v923_v4  ;;  %v935_v18 = vld [vmem:[%s1287_s24] ss:$8 sps:$4 sm:$0xff]   ;;  %v943_v21 = vld [vmem:[%s1287_s24 + $0x54] ss:$8 sps:$4 sm:$0xff]   ;;  %v946_v23 = vld [vmem:[%s1287_s24 + $0x50] ss:$8 sps:$4 sm:$0xff]   ;;  %p1020_p8 = pneg %p1019_p6 }
  0x63   : > { %531 = vmatprep.mubr.bf16.mxu1 %v940_v12  ;;  %v938_v19 = vld [vmem:[%s1287_s24 + $0x40] ss:$8 sps:$4 sm:$0xff]   ;;  %v947_v24 = vld [vmem:[%s1287_s24 + $0x24] ss:$8 sps:$4 sm:$0xff]   ;;  %v953_v28 = vld [vmem:[%s1287_s24 + $0x34] ss:$8 sps:$4 sm:$0xff]   ;;  %p1026_p0 = por %p1025_p11, %p1024_p12 }
  0x64   : > { %v949_v25 = vld [vmem:[%s1287_s24 + $0x64] ss:$8 sps:$4 sm:$0xff]   ;;  %v951_v26 = vld [vmem:[%s1287_s24 + $0x20] ss:$8 sps:$4 sm:$0xff]   ;;  %v955_v29 = vld [vmem:[%s1287_s24 + $0x74] ss:$8 sps:$4 sm:$0xff]  }
  0x65   : > { %764 = vmatpush3.bf16.msra.mxu0 %v924_v5  ;;  %833 = vmatpush3.bf16.msra.mxu1 %v924_v5  ;;  %v952_v27 = vld [vmem:[%s1287_s24 + $0x60] ss:$8 sps:$4 sm:$0xff]   ;;  %v957_v30 = vld [vmem:[%s1287_s24 + $0x30] ss:$8 sps:$4 sm:$0xff]   ;;  %p1027_p5 = pnand %p1026_p0, %p1020_p8 }
  0x66   : > { %765 = vmatprep.subr.bf16.mxu0 %v925_v6  ;;  %826 = vmatprep.subr.bf16.mxu1 %v925_v6  ;;  %v958_v31 = vld [vmem:[%s1287_s24 + $0x70] ss:$8 sps:$4 sm:$0xff]  }
  0x69   : > { %766 = vmatpush3.bf16.msra.mxu0 %v926_v7  ;;  %834 = vmatpush3.bf16.msra.mxu1 %v926_v7 }
  0x6a   : > { %767 = vmatprep.subr.bf16.mxu0 %v927_v8  ;;  %827 = vmatprep.subr.bf16.mxu1 %v927_v8 }
  0x6d   : > { %768 = vmatpush3.bf16.msra.mxu0 %v928_v9  ;;  %835 = vmatpush3.bf16.msra.mxu1 %v928_v9 }
  0x6e   : > { %769 = vmatprep.subr.bf16.mxu0 %v929_v10  ;;  %828 = vmatprep.subr.bf16.mxu1 %v929_v10 }
  0x71   : > { %770 = vmatpush3.bf16.msra.mxu0 %v930_v13  ;;  %836 = vmatpush3.bf16.msra.mxu1 %v930_v13 }
  0x72   : > { %771 = vmatprep.subr.bf16.mxu0 %v931_v14  ;;  %829 = vmatprep.subr.bf16.mxu1 %v931_v14 }
  0x75   : > { %772 = vmatpush3.bf16.msra.mxu0 %v932_v15  ;;  %837 = vmatpush3.bf16.msra.mxu1 %v932_v15 }
  0x76   : > { %773 = vmatprep.subr.bf16.mxu0 %v933_v16  ;;  %830 = vmatprep.subr.bf16.mxu1 %v933_v16 }
  0x79   : > { %774 = vmatpush3.bf16.msra.mxu0 %v934_v17  ;;  %838 = vmatpush3.bf16.msra.mxu1 %v934_v17 }
  0x7c   : > { %500 = vmatmul.mubr.bf16.vlgmr.msra.gmra.mrb[0].mxu0 %v935_v18  ;;  %532 = vmatmul.mubr.bf16.vlgmr.msra.gmra.mrb[0].mxu1 %v938_v19 }
  0x7d   : > { %507 = vmatprep.mubr.bf16.mxu0 %v941_v20  ;;  %539 = vmatprep.mubr.bf16.mxu1 %v943_v21 }
  0x84   : > { %508 = vmatmul.mubr.bf16.gmra.mrb[4].mxu0 %v945_v22  ;;  %540 = vmatmul.mubr.bf16.gmra.mrb[4].mxu1 %v946_v23 }
  0x85   : > { %515 = vmatprep.mubr.bf16.mxu0 %v947_v24  ;;  %547 = vmatprep.mubr.bf16.mxu1 %v949_v25 }
  0x8c   : > { %516 = vmatmul.mubr.bf16.gmra.mrb[8].mxu0 %v951_v26  ;;  %548 = vmatmul.mubr.bf16.gmra.mrb[8].mxu1 %v952_v27 }
  0x8d   : > { %523 = vmatprep.mubr.bf16.mxu0 %v953_v28  ;;  %555 = vmatprep.mubr.bf16.mxu1 %v955_v29 }
  0x94   : > { %524 = vmatmul.mubr.bf16.gmra.mrb[12].mxu0 %v957_v30  ;;  %556 = vmatmul.mubr.bf16.gmra.mrb[12].mxu1 %v958_v31 }
 0x14f   : > { %v775_v32 = vpop.f32.mrb[0].mxu0  ;;  %v799_v33 = vpop.f32.mrb[0].mxu1 }
 0x150   : > { %v776_v34 = vpop.f32.mrb[1].mxu0  ;;  %v800_v35 = vpop.f32.mrb[1].mxu1 }
 0x151   : > { %v777_v36 = vadd.f32 %v776_v34, %v775_v32  ;;  %v801_v37 = vadd.f32 %v800_v35, %v799_v33  ;;  %v778_v38 = vpop.f32.mrb[2].mxu0  ;;  %v802_v39 = vpop.f32.mrb[2].mxu1 }
 0x152   : > { %v779_v40 = vpop.f32.mrb[3].mxu0  ;;  %v803_v41 = vpop.f32.mrb[3].mxu1 }
 0x153   : > { %v780_v42 = vadd.f32 %v779_v40, %v778_v38  ;;  %v804_v43 = vadd.f32 %v803_v41, %v802_v39  ;;  %580 = vst [vmem:[%s1315_s17] sm:$0xff] %v777_v36  ;;  %588 = vst [vmem:[%s1315_s17 + $0x40] sm:$0xff] %v801_v37 }
 0x155   : > { %581 = vst [vmem:[%s1315_s17 + $0x8] sm:$0xff] %v780_v42  ;;  %589 = vst [vmem:[%s1315_s17 + $0x48] sm:$0xff] %v804_v43 }
 0x157   : > { %v781_v44 = vpop.f32.mrb[4].mxu0  ;;  %v805_v45 = vpop.f32.mrb[4].mxu1 }
 0x158   : > { %v782_v46 = vpop.f32.mrb[5].mxu0  ;;  %v806_v47 = vpop.f32.mrb[5].mxu1 }
 0x159   : > { %v783_v48 = vadd.f32 %v782_v46, %v781_v44  ;;  %v807_v49 = vadd.f32 %v806_v47, %v805_v45  ;;  %v784_v50 = vpop.f32.mrb[6].mxu0  ;;  %v808_v51 = vpop.f32.mrb[6].mxu1 }
 0x15a   : > { %v785_v52 = vpop.f32.mrb[7].mxu0  ;;  %v809_v53 = vpop.f32.mrb[7].mxu1 }
 0x15b   : > { %v786_v54 = vadd.f32 %v785_v52, %v784_v50  ;;  %v810_v55 = vadd.f32 %v809_v53, %v808_v51  ;;  %582 = vst [vmem:[%s1315_s17 + $0x10] sm:$0xff] %v783_v48  ;;  %590 = vst [vmem:[%s1315_s17 + $0x50] sm:$0xff] %v807_v49 }
 0x15d   : > { %583 = vst [vmem:[%s1315_s17 + $0x18] sm:$0xff] %v786_v54  ;;  %591 = vst [vmem:[%s1315_s17 + $0x58] sm:$0xff] %v810_v55 }
 0x15f   : > { %v787_v56 = vpop.f32.mrb[8].mxu0  ;;  %v811_v57 = vpop.f32.mrb[8].mxu1 }
 0x160   : > { %v788_v58 = vpop.f32.mrb[9].mxu0  ;;  %v812_v59 = vpop.f32.mrb[9].mxu1 }
 0x161   : > { %v789_v60 = vadd.f32 %v788_v58, %v787_v56  ;;  %v813_v61 = vadd.f32 %v812_v59, %v811_v57  ;;  %v790_v62 = vpop.f32.mrb[10].mxu0  ;;  %v814_v63 = vpop.f32.mrb[10].mxu1 }
 0x162   : > { %v791_v0 = vpop.f32.mrb[11].mxu0  ;;  %v815_v1 = vpop.f32.mrb[11].mxu1 }
 0x163   : > { %v792_v2 = vadd.f32 %v791_v0, %v790_v62  ;;  %v816_v3 = vadd.f32 %v815_v1, %v814_v63  ;;  %584 = vst [vmem:[%s1315_s17 + $0x20] sm:$0xff] %v789_v60  ;;  %592 = vst [vmem:[%s1315_s17 + $0x60] sm:$0xff] %v813_v61 }
 0x165   : > { %585 = vst [vmem:[%s1315_s17 + $0x28] sm:$0xff] %v792_v2  ;;  %593 = vst [vmem:[%s1315_s17 + $0x68] sm:$0xff] %v816_v3 }
 0x167   : > { %v793_v4 = vpop.f32.mrb[12].mxu0  ;;  %v817_v5 = vpop.f32.mrb[12].mxu1 }
 0x168   : > { %v794_v6 = vpop.f32.mrb[13].mxu0  ;;  %v818_v7 = vpop.f32.mrb[13].mxu1 }
 0x169   : > { %v795_v8 = vadd.f32 %v794_v6, %v793_v4  ;;  %v819_v9 = vadd.f32 %v818_v7, %v817_v5  ;;  %v796_v10 = vpop.f32.mrb[14].mxu0  ;;  %v820_v11 = vpop.f32.mrb[14].mxu1 }
 0x16a   : > { %v797_v12 = vpop.f32.mrb[15].mxu0  ;;  %v821_v13 = vpop.f32.mrb[15].mxu1 }
 0x16b   : > { %v798_v14 = vadd.f32 %v797_v12, %v796_v10  ;;  %v822_v15 = vadd.f32 %v821_v13, %v820_v11  ;;  %586 = vst [vmem:[%s1315_s17 + $0x30] sm:$0xff] %v795_v8  ;;  %594 = vst [vmem:[%s1315_s17 + $0x70] sm:$0xff] %v819_v9 }
 0x16d   : > { %587 = vst [vmem:[%s1315_s17 + $0x38] sm:$0xff] %v798_v14  ;;  %595 = vst [vmem:[%s1315_s17 + $0x78] sm:$0xff] %v822_v15 }
 0x16e   : > { %1030 = shalt.err (!%p1027_p5)
}
 0x16f   : > { %s1031_s30 = scalar_lea.hbm %s1334_s6, 2048  ;;  %s1035_s8 = scalar_lea.hbm %s1391_s2, 4096 }
 0x170   : > { %p1032_p9 = scmp.ne.s32.totalorder %s1334_s6, %s1031_s30  ;;  %p1036_p3 = scmp.lt.u32.totalorder %s1334_s6, %s1391_s2 }
 0x171   : > { %p1037_p7 = scmp.lt.u32.totalorder %s1035_s8, %s1031_s30  ;;  %p1039_p4 = scmp.lt.u32.totalorder %s1031_s30, %s1334_s6 }
 0x172   : > { %p1033_p1 = pnand %p1032_p9, %p1225_p10 }
 0x173   : > { %p1038_p13 = por %p1037_p7, %p1036_p3 }
 0x174   : > { %p1034_p2 = pneg %p1033_p1 }
 0x175   : > { %p1040_p6 = por %p1039_p4, %p1038_p13 }
 0x177   : > { %p1041_p8 = pnand %p1040_p6, %p1034_p2 }
 0x179   : > { %1044 = shalt.err (!%p1041_p8)
}
 0x17a   : > { %s1112_s24 = smov 128   ;;  %s1113_s17 = smov 8  }
 0x17b   : > { %845 = dma.vmem_to_hbm [thread:$0]  (%p1225_p10), %s1336_s21, 2048, %s1334_s6, %s597_s12, %s1112_s24, %s1112_s24, %s1113_s17  }
 0x17c PF: > { %s625_s19 = sand.u32 1, %s1083_s9   ;;  %p1409_p12 = scmp.ne.s32.totalorder %s1399_s20, 0 }
 0x17d   : > { %p1410_p11 = scmp.ge.s32.totalorder %s1103_s14, 2  ;;  %s626_s4 = scalar_lea.sflag [#allocation4], %s625_s19 }
 0x17f   : > { %p856_p0 = pnand %p1410_p11, %p1409_p12 }
 0x181   : > { %1078 = dma.done.wait (!%p856_p0), %s626_s4, 2048  }
 0x182   : > { %1080 = vsyncadd (!%p856_p0), %s626_s4, 4294965248  ;;  %s19_s14 = sadd.s32 1, %s1103_s14   ;;  %s1411_s9 = smov %s1087_s10 }
 0x183   : > { %p16_p5 = scmp.ge.s32.totalorder %s19_s14, 4   ;;  %s1412_s10 = smov %s1091_s11 }
 0x184   : > { %s1413_s11 = smov %s1234_s28  ;;  %s1414_s12 = smov %s1099_s13 }
 0x185   : > { %s1415_s13 = smov %s1417_s25  ;;  %18 = sbr.rel (!%p16_p5) target bundleno = 7 (0x7), region = 82 }
 0x18c   :  { %631 = vsyncpa [#allocation3], 1 }
 0x18d   :  { %633 = vsyncpa [#allocation3 + $0x1], 1 }
 0x18e   :  { %634 = vsyncpa [#allocation6], 1 }
 0x18f   :  { %635 = vsyncpa [#allocation4], 1 }
 0x190   :  { %637 = vsyncpa [#allocation4 + $0x1], 1 }

</bundles_post_ra>
